<compile_context>
chip_gen: v7x
topology: tpu7x:2x2x1
jax: 0.10.0
libtpu: 0.0.40
codegen_flags: <defaults>
</compile_context>

<pallas_src>
import jax
import jax.numpy as jnp
from jax.experimental import pallas as pl
from jax.experimental.pallas import tpu as pltpu


# --------------------------------------------------------------- kernels ----
def _kernel_col(zs_ref, zd_ref, ws_ref, wd_ref, b_ref, wf_ref, bf_ref, o_ref):
    """Primary form: column-first final Linear, lane-dense (1, tile_m) output."""
    cd = ws_ref.dtype
    # Cast activations to the MXU compute dtype in-kernel (VPU cast hides
    # under the DMA of the next tile); accumulate in f32.
    h = jnp.dot(zs_ref[...].astype(cd), ws_ref[...],
                preferred_element_type=jnp.float32)
    h = h + jnp.dot(zd_ref[...].astype(cd), wd_ref[...],
                    preferred_element_type=jnp.float32)
    h = jnp.maximum(h + b_ref[...], 0.0)                      # (tile_m, C) f32
    # Final Linear(C, 1): thin column matmul, then relayout only the
    # (tile_m, 1) column to the lane-dense (1, tile_m) output row.
    col = jnp.dot(h.astype(cd), wf_ref[...],
                  preferred_element_type=jnp.float32)         # (tile_m, 1)
    o_ref[...] = (col.T + bf_ref[0]).astype(o_ref.dtype)      # (1, tile_m)


def _kernel_row(zs_ref, zd_ref, ws_ref, wd_ref, b_ref, wf_ref, bf_ref, o_ref):
    """Fallback form (known-good lowering): (1,C) @ h.T -> (1, tile_m)."""
    cd = ws_ref.dtype
    h = jnp.dot(zs_ref[...].astype(cd), ws_ref[...],
                preferred_element_type=jnp.float32)
    h = h + jnp.dot(zd_ref[...].astype(cd), wd_ref[...],
                    preferred_element_type=jnp.float32)
    h = jnp.maximum(h + b_ref[...], 0.0)                      # (tile_m, C) f32
    row = jnp.dot(wf_ref[...], h.T, preferred_element_type=jnp.float32)
    o_ref[...] = (row + bf_ref[0]).astype(o_ref.dtype)        # (1, tile_m)


# ----------------------------------------------------------- tile sizing ----
def _round_up(x, m):
    return ((x + m - 1) // m) * m


def _vmem_capacity_bytes():
    """Per-core VMEM capacity; conservative 64 MiB (v7x) if the query fails."""
    try:
        cap = int(pltpu.get_tpu_info().vmem_capacity_bytes)
        return max(cap, 32 * 1024 * 1024)
    except Exception:
        return 64 * 1024 * 1024


def _default_tile_m(n, c, cd_itemsize, vmem_budget):
    """Row tile: fits VMEM (all live buffers counted), moves >= ~4 MiB of
    activations per grid step, and keeps >= 2 grid steps for v7x megacore."""
    # Grid-invariant blocks, budgeted double-buffered (worst case: the
    # single-buffer request may be ignored / fall back).
    fixed = 2 * (2 * c * c * cd_itemsize        # two CxC weights
                 + 8 * c * 4                    # folded bias (1,C), sublane pad
                 + 128 * c * cd_itemsize)       # final weight, lane pad
    fixed += 1 << 20                            # compiler-internal slack
    # Per-row VMEM: f32 activations x 2 inputs x 2 buffers, in-kernel casts of
    # zs/zd/h, f32 hidden tile, fallback transpose copy, thin col + out rows.
    per_row = c * (16 + 4 + 4 + 3 * cd_itemsize) + 32
    avail = max(vmem_budget - fixed, 64 * per_row)
    vmem_rows = avail // per_row
    # HBM-traffic target: >= ~4 MiB of activation reads per grid step.
    target_rows = max((4 << 20) // (2 * c * 4), 1024)
    t = int(min(vmem_rows, target_rows))
    n8 = _round_up(n, 8)
    if n8 >= 256:                               # keep >= 2 steps (v7x: 2 TCs)
        half = _round_up(pl.cdiv(n8, 2), 128)
        t = min(t, max(half, 128))
    t = max(8, min(t, n8))
    align = 128 if t >= 128 else 8
    return int(max(8, (t // align) * align))


# ----------------------------------------------------------- pallas call ----
def _forward(zs, zd, ws, wd, b_sum, wf, bf, *, tile_m, num_tiles, variant,
             single_buffer, vmem_limit, flops, bytes_accessed):
    N, C = zs.shape

    def inv_spec(shape):
        index_map = lambda i, _s=shape: (0,) * len(_s)   # grid-invariant
        if single_buffer:
            return pl.BlockSpec(shape, index_map, pipeline_mode=pl.Buffered(1))
        return pl.BlockSpec(shape, index_map)

    row_spec = pl.BlockSpec((tile_m, C), lambda i: (i, 0))
    out_spec = pl.BlockSpec((1, tile_m), lambda i: (i, 0))      # lane-dense
    smem_spec = pl.BlockSpec(memory_space=pltpu.MemorySpace.SMEM)

    kernel = _kernel_col if variant == "col" else _kernel_row

    return pl.pallas_call(
        kernel,
        out_shape=jax.ShapeDtypeStruct((num_tiles, tile_m), jnp.float32),
        grid_spec=pltpu.PrefetchScalarGridSpec(
            num_scalar_prefetch=0,
            grid=(num_tiles,),
            in_specs=[row_spec, row_spec, inv_spec((C, C)), inv_spec((C, C)),
                      inv_spec((1, C)), inv_spec(wf.shape), smem_spec],
            out_specs=out_spec,
        ),
        compiler_params=pltpu.CompilerParams(
            dimension_semantics=("parallel",),
            vmem_limit_bytes=int(vmem_limit),
        ),
        cost_estimate=pl.CostEstimate(
            flops=flops, transcendentals=0, bytes_accessed=bytes_accessed),
    )(zs, zd, ws, wd, b_sum, wf, bf)


_BEST_CONFIG = None   # cached (single_buffer, variant) that lowered cleanly


def link_predictor(z_src, z_dst, params, *, tile_m=None,
                   compute_dtype=jnp.bfloat16):
    """Pallas forward pass. z_src, z_dst: (N, C). Returns (N, 1) float32."""
    global _BEST_CONFIG
    N, C = z_src.shape
    w_src, b_src, w_dst, b_dst, w_fin, b_fin = params
    cd = jnp.dtype(compute_dtype)

    vmem_cap = _vmem_capacity_bytes()            # generation-aware (v5e/v6e/v7x)
    vmem_budget = int(vmem_cap * 0.65)
    vmem_limit = int(vmem_cap * 0.80)

    if tile_m is None:
        tile_m = _default_tile_m(N, C, cd.itemsize, vmem_budget)
    tile_m = max(8, (int(tile_m) // 8) * 8)
    num_tiles = int(pl.cdiv(N, tile_m))          # ragged tail: OOB-padded block

    # Weights / biases are tiny: cast once in the wrapper.  Activations are
    # passed through untouched (cast in-kernel) -- no extra HBM pass.
    ws = w_src.astype(cd)
    wd = w_dst.astype(cd)
    b_sum = (b_src + b_dst).reshape(1, C).astype(jnp.float32)  # folded bias
    wf_col = w_fin.reshape(C, 1).astype(cd)                    # primary layout
    wf_row = w_fin.reshape(1, C).astype(jnp.float32)           # fallback layout
    bf = b_fin.reshape(1).astype(jnp.float32)                  # SMEM scalar

    in_itemsize = jnp.dtype(z_src.dtype).itemsize
    flops = 4 * N * C * C + 6 * N * C
    bytes_accessed = (2 * N * C * in_itemsize       # activation streams (once)
                      + 2 * C * C * cd.itemsize     # weights
                      + (3 * C + 1) * 4             # biases + final weight
                      + num_tiles * tile_m * 4)     # lane-dense output

    configs = [(sb, var) for sb in (True, False) for var in ("col", "row")]
    if _BEST_CONFIG is not None and _BEST_CONFIG in configs:
        configs = [_BEST_CONFIG] + [c for c in configs if c != _BEST_CONFIG]

    out, last_err = None, None
    for single_buffer, variant in configs:
        try:
            out = _forward(
                z_src, z_dst, ws, wd, b_sum,
                wf_col if variant == "col" else wf_row, bf,
                tile_m=tile_m, num_tiles=num_tiles, variant=variant,
                single_buffer=single_buffer, vmem_limit=vmem_limit,
                flops=flops, bytes_accessed=bytes_accessed)
            _BEST_CONFIG = (single_buffer, variant)
            break
        except Exception as e:     # lowering/compile fallback only
            last_err = e
    if out is None:
        raise last_err

    # (num_tiles, tile_m) lane-dense rows -> (N, 1); OOB-tail garbage dropped.
    return out.reshape(-1)[:N, None]


# ------------------------------------------------------------- reference ----
def init_params(key, in_channels):
    """Deterministic synthetic parameters matching LinkPredictor(in_channels)."""
    k = jax.random.split(key, 6)
    scale = 1.0 / jnp.sqrt(in_channels)
    # Stored as (in, out) == PyTorch weight.T
    w_src = jax.random.uniform(k[0], (in_channels, in_channels),
                               jnp.float32, -scale, scale)
    b_src = jax.random.uniform(k[1], (1, in_channels), jnp.float32, -scale, scale)
    w_dst = jax.random.uniform(k[2], (in_channels, in_channels),
                               jnp.float32, -scale, scale)
    b_dst = jax.random.uniform(k[3], (1, in_channels), jnp.float32, -scale, scale)
    w_fin = jax.random.uniform(k[4], (in_channels, 1), jnp.float32, -scale, scale)
    b_fin = jax.random.uniform(k[5], (1, 1), jnp.float32, -scale, scale)
    return (w_src, b_src, w_dst, b_dst, w_fin, b_fin)


def link_predictor_ref(z_src, z_dst, params, compute_dtype=jnp.float32):
    """Pure-JAX reference; mirrors the kernel's mixed precision."""
    w_src, b_src, w_dst, b_dst, w_fin, b_fin = params
    f32 = jnp.float32
    cast = lambda x: x.astype(compute_dtype).astype(f32)
    h = (cast(z_src) @ cast(w_src) + cast(z_dst) @ cast(w_dst)
         + (b_src + b_dst).astype(f32))
    h = jnp.maximum(h, 0.0)
    return cast(h) @ cast(w_fin) + b_fin.astype(f32)


# ------------------------------------------------------------------ main ----
if __name__ == "__main__":
    key = jax.random.PRNGKey(0)
    k_param, k1, k2, k3, k4, k5, k6 = jax.random.split(key, 7)

    N, C = 8, 32  # batch of 8 node-pair embeddings, in_channels = 32
    params = init_params(k_param, C)
    z_src = jax.random.normal(k1, (N, C), jnp.float32)
    z_dst = jax.random.normal(k2, (N, C), jnp.float32)

    # 1) Full-f32 path: tight semantics check against the reference.
    out_f32 = jax.block_until_ready(
        link_predictor(z_src, z_dst, params, compute_dtype=jnp.float32))
    ref_f32 = link_predictor_ref(z_src, z_dst, params)
    assert out_f32.shape == (N, 1)
    assert jnp.allclose(out_f32, ref_f32, atol=1e-5, rtol=1e-5)

    # 2) Default bf16-operand path (f32 accumulation / bias / ReLU).
    out_bf16 = jax.block_until_ready(link_predictor(z_src, z_dst, params))
    ref_bf16 = link_predictor_ref(z_src, z_dst, params,
                                  compute_dtype=jnp.bfloat16)
    assert out_bf16.shape == (N, 1)
    assert jnp.allclose(out_bf16, ref_bf16, atol=5e-3, rtol=5e-3)

    # 3) Ragged batch, explicit small tile -> multi-tile grid with an
    #    OOB-padded (unpadded-in-HBM) tail block.
    N2 = 40
    z_src2 = jax.random.normal(k3, (N2, C), jnp.float32)
    z_dst2 = jax.random.normal(k4, (N2, C), jnp.float32)
    out2 = jax.block_until_ready(
        link_predictor(z_src2, z_dst2, params, tile_m=16))
    ref2 = link_predictor_ref(z_src2, z_dst2, params,
                              compute_dtype=jnp.bfloat16)
    assert out2.shape == (N2, 1)
    assert jnp.allclose(out2, ref2, atol=5e-3, rtol=5e-3)

    # 4) Larger ragged batch with default (auto) tiling: exercises the
    #    >=2-grid-step rule and the ragged last block under auto tile_m.
    N3 = 300
    z_src3 = jax.random.normal(k5, (N3, C), jnp.float32)
    z_dst3 = jax.random.normal(k6, (N3, C), jnp.float32)
    out3 = jax.block_until_ready(link_predictor(z_src3, z_dst3, params))
    ref3 = link_predictor_ref(z_src3, z_dst3, params,
                              compute_dtype=jnp.bfloat16)
    assert out3.shape == (N3, 1)
    assert jnp.allclose(out3, ref3, atol=5e-3, rtol=5e-3)

    print("KERNEL_OK")
</pallas_src>

<mosaic_0001>
module attributes {stable_mosaic.version = 11 : i64} {
  func.func @_kernel_col(%arg0: i32, %arg1: memref<8x32xf32, #tpu.memory_space<vmem>>, %arg2: memref<8x32xf32, #tpu.memory_space<vmem>>, %arg3: memref<32x32xf32, #tpu.memory_space<vmem>>, %arg4: memref<32x32xf32, #tpu.memory_space<vmem>>, %arg5: memref<1x32xf32, #tpu.memory_space<vmem>>, %arg6: memref<32x1xf32, #tpu.memory_space<vmem>>, %arg7: memref<1xf32, #tpu.memory_space<smem>>, %arg8: memref<1x8xf32, #tpu.memory_space<vmem>>) attributes {dimension_semantics = [#tpu.dimension_semantics<parallel>], iteration_bounds = array<i64: 1>, scalar_prefetch = 0 : i64, scratch_operands = 0 : i64, tpu.core_type = #tpu.core_type<tc>, window_params = [{transform_indices = @transform_0, window_bounds = array<i64: 8, 32>}, {transform_indices = @transform_1, window_bounds = array<i64: 8, 32>}, {pipeline_mode = #tpu.pipeline_mode<synchronous>, transform_indices = @transform_2, window_bounds = array<i64: 32, 32>}, {pipeline_mode = #tpu.pipeline_mode<synchronous>, transform_indices = @transform_3, window_bounds = array<i64: 32, 32>}, {pipeline_mode = #tpu.pipeline_mode<synchronous>, transform_indices = @transform_4, window_bounds = array<i64: 1, 32>}, {pipeline_mode = #tpu.pipeline_mode<synchronous>, transform_indices = @transform_5, window_bounds = array<i64: 32, 1>}, {transform_indices = @transform_6, window_bounds = array<i64: 1>}, {transform_indices = @transform_7, window_bounds = array<i64: 1, 8>}]} {
    %c0 = arith.constant 0 : index
    %c0_0 = arith.constant 0 : index
    %0 = vector.load %arg1[%c0, %c0_0] : memref<8x32xf32, #tpu.memory_space<vmem>>, vector<8x32xf32>
    %c0_1 = arith.constant 0 : index
    %c0_2 = arith.constant 0 : index
    %1 = vector.load %arg3[%c0_1, %c0_2] : memref<32x32xf32, #tpu.memory_space<vmem>>, vector<32x32xf32>
    %cst = arith.constant dense<0.000000e+00> : vector<8x32xf32>
    %2 = tpu.matmul %0, %1, %cst {dimension_numbers = #tpu.dot_dimension_numbers<[1], [0], [0], [1], [0, 0, 1, 1], [], []>} : vector<8x32xf32>, vector<32x32xf32>, vector<8x32xf32> -> vector<8x32xf32>
    %c0_3 = arith.constant 0 : index
    %c0_4 = arith.constant 0 : index
    %3 = vector.load %arg2[%c0_3, %c0_4] : memref<8x32xf32, #tpu.memory_space<vmem>>, vector<8x32xf32>
    %c0_5 = arith.constant 0 : index
    %c0_6 = arith.constant 0 : index
    %4 = vector.load %arg4[%c0_5, %c0_6] : memref<32x32xf32, #tpu.memory_space<vmem>>, vector<32x32xf32>
    %cst_7 = arith.constant dense<0.000000e+00> : vector<8x32xf32>
    %5 = tpu.matmul %3, %4, %cst_7 {dimension_numbers = #tpu.dot_dimension_numbers<[1], [0], [0], [1], [0, 0, 1, 1], [], []>} : vector<8x32xf32>, vector<32x32xf32>, vector<8x32xf32> -> vector<8x32xf32>
    %6 = arith.addf %2, %5 : vector<8x32xf32>
    %c0_8 = arith.constant 0 : index
    %c0_9 = arith.constant 0 : index
    %7 = vector.load %arg5[%c0_8, %c0_9] : memref<1x32xf32, #tpu.memory_space<vmem>>, vector<1x32xf32>
    %8 = vector.broadcast %7 : vector<1x32xf32> to vector<8x32xf32>
    %9 = arith.addf %6, %8 : vector<8x32xf32>
    %cst_10 = arith.constant 0.000000e+00 : f32
    %10 = vector.broadcast %cst_10 : f32 to vector<8x32xf32>
    %11 = arith.maximumf %9, %10 : vector<8x32xf32>
    %c0_11 = arith.constant 0 : index
    %c0_12 = arith.constant 0 : index
    %12 = vector.load %arg6[%c0_11, %c0_12] : memref<32x1xf32, #tpu.memory_space<vmem>>, vector<32x1xf32>
    %cst_13 = arith.constant dense<0.000000e+00> : vector<8x1xf32>
    %13 = tpu.matmul %11, %12, %cst_13 {dimension_numbers = #tpu.dot_dimension_numbers<[1], [0], [0], [1], [0, 0, 1, 1], [], []>} : vector<8x32xf32>, vector<32x1xf32>, vector<8x1xf32> -> vector<8x1xf32>
    %14 = tpu.transpose %13, [1, 0] : vector<8x1xf32> -> vector<1x8xf32>
    %c0_14 = arith.constant 0 : index
    %15 = memref.load %arg7[%c0_14] : memref<1xf32, #tpu.memory_space<smem>>
    %16 = vector.broadcast %15 : f32 to vector<1x8xf32>
    %17 = arith.addf %14, %16 : vector<1x8xf32>
    %c0_15 = arith.constant 0 : index
    %c0_16 = arith.constant 0 : index
    %18 = vector.load %arg8[%c0_15, %c0_16] : memref<1x8xf32, #tpu.memory_space<vmem>>, vector<1x8xf32>
    tpu.vector_store %arg8[%c0_15, %c0_16], %17 {strides = array<i32>} : memref<1x8xf32, #tpu.memory_space<vmem>>, vector<1x8xf32>,
    return
  }
  func.func @transform_0(%arg0: i32) -> (i32, i32) {
    %c0_i32 = arith.constant 0 : i32
    %c0_i32_0 = arith.constant 0 : i32
    return %arg0, %c0_i32 : i32, i32
  }
  func.func @transform_1(%arg0: i32) -> (i32, i32) {
    %c0_i32 = arith.constant 0 : i32
    %c0_i32_0 = arith.constant 0 : i32
    return %arg0, %c0_i32 : i32, i32
  }
  func.func @transform_2(%arg0: i32) -> (i32, i32) {
    %c0_i32 = arith.constant 0 : i32
    %c0_i32_0 = arith.constant 0 : i32
    %c0_i32_1 = arith.constant 0 : i32
    return %c0_i32, %c0_i32_0 : i32, i32
  }
  func.func @transform_3(%arg0: i32) -> (i32, i32) {
    %c0_i32 = arith.constant 0 : i32
    %c0_i32_0 = arith.constant 0 : i32
    %c0_i32_1 = arith.constant 0 : i32
    return %c0_i32, %c0_i32_0 : i32, i32
  }
  func.func @transform_4(%arg0: i32) -> (i32, i32) {
    %c0_i32 = arith.constant 0 : i32
    %c0_i32_0 = arith.constant 0 : i32
    %c0_i32_1 = arith.constant 0 : i32
    return %c0_i32, %c0_i32_0 : i32, i32
  }
  func.func @transform_5(%arg0: i32) -> (i32, i32) {
    %c0_i32 = arith.constant 0 : i32
    %c0_i32_0 = arith.constant 0 : i32
    %c0_i32_1 = arith.constant 0 : i32
    return %c0_i32, %c0_i32_0 : i32, i32
  }
  func.func @transform_6(%arg0: i32) -> i32 {
    %c0_i32 = arith.constant 0 : i32
    %c0_i32_0 = arith.constant 0 : i32
    return %c0_i32 : i32
  }
  func.func @transform_7(%arg0: i32) -> (i32, i32) {
    %c0_i32 = arith.constant 0 : i32
    %c0_i32_0 = arith.constant 0 : i32
    return %arg0, %c0_i32 : i32, i32
  }
}

module attributes {stable_mosaic.version = 11 : i64} {
  func.func @_kernel_row(%arg0: i32, %arg1: memref<8x32xf32, #tpu.memory_space<vmem>>, %arg2: memref<8x32xf32, #tpu.memory_space<vmem>>, %arg3: memref<32x32xf32, #tpu.memory_space<vmem>>, %arg4: memref<32x32xf32, #tpu.memory_space<vmem>>, %arg5: memref<1x32xf32, #tpu.memory_space<vmem>>, %arg6: memref<1x32xf32, #tpu.memory_space<vmem>>, %arg7: memref<1xf32, #tpu.memory_space<smem>>, %arg8: memref<1x8xf32, #tpu.memory_space<vmem>>) attributes {dimension_semantics = [#tpu.dimension_semantics<parallel>], iteration_bounds = array<i64: 1>, scalar_prefetch = 0 : i64, scratch_operands = 0 : i64, tpu.core_type = #tpu.core_type<tc>, window_params = [{transform_indices = @transform_0, window_bounds = array<i64: 8, 32>}, {transform_indices = @transform_1, window_bounds = array<i64: 8, 32>}, {pipeline_mode = #tpu.pipeline_mode<synchronous>, transform_indices = @transform_2, window_bounds = array<i64: 32, 32>}, {pipeline_mode = #tpu.pipeline_mode<synchronous>, transform_indices = @transform_3, window_bounds = array<i64: 32, 32>}, {pipeline_mode = #tpu.pipeline_mode<synchronous>, transform_indices = @transform_4, window_bounds = array<i64: 1, 32>}, {pipeline_mode = #tpu.pipeline_mode<synchronous>, transform_indices = @transform_5, window_bounds = array<i64: 1, 32>}, {transform_indices = @transform_6, window_bounds = array<i64: 1>}, {transform_indices = @transform_7, window_bounds = array<i64: 1, 8>}]} {
    %c0 = arith.constant 0 : index
    %c0_0 = arith.constant 0 : index
    %0 = vector.load %arg1[%c0, %c0_0] : memref<8x32xf32, #tpu.memory_space<vmem>>, vector<8x32xf32>
    %c0_1 = arith.constant 0 : index
    %c0_2 = arith.constant 0 : index
    %1 = vector.load %arg3[%c0_1, %c0_2] : memref<32x32xf32, #tpu.memory_space<vmem>>, vector<32x32xf32>
    %cst = arith.constant dense<0.000000e+00> : vector<8x32xf32>
    %2 = tpu.matmul %0, %1, %cst {dimension_numbers = #tpu.dot_dimension_numbers<[1], [0], [0], [1], [0, 0, 1, 1], [], []>} : vector<8x32xf32>, vector<32x32xf32>, vector<8x32xf32> -> vector<8x32xf32>
    %c0_3 = arith.constant 0 : index
    %c0_4 = arith.constant 0 : index
    %3 = vector.load %arg2[%c0_3, %c0_4] : memref<8x32xf32, #tpu.memory_space<vmem>>, vector<8x32xf32>
    %c0_5 = arith.constant 0 : index
    %c0_6 = arith.constant 0 : index
    %4 = vector.load %arg4[%c0_5, %c0_6] : memref<32x32xf32, #tpu.memory_space<vmem>>, vector<32x32xf32>
    %cst_7 = arith.constant dense<0.000000e+00> : vector<8x32xf32>
    %5 = tpu.matmul %3, %4, %cst_7 {dimension_numbers = #tpu.dot_dimension_numbers<[1], [0], [0], [1], [0, 0, 1, 1], [], []>} : vector<8x32xf32>, vector<32x32xf32>, vector<8x32xf32> -> vector<8x32xf32>
    %6 = arith.addf %2, %5 : vector<8x32xf32>
    %c0_8 = arith.constant 0 : index
    %c0_9 = arith.constant 0 : index
    %7 = vector.load %arg5[%c0_8, %c0_9] : memref<1x32xf32, #tpu.memory_space<vmem>>, vector<1x32xf32>
    %8 = vector.broadcast %7 : vector<1x32xf32> to vector<8x32xf32>
    %9 = arith.addf %6, %8 : vector<8x32xf32>
    %cst_10 = arith.constant 0.000000e+00 : f32
    %10 = vector.broadcast %cst_10 : f32 to vector<8x32xf32>
    %11 = arith.maximumf %9, %10 : vector<8x32xf32>
    %c0_11 = arith.constant 0 : index
    %c0_12 = arith.constant 0 : index
    %12 = vector.load %arg6[%c0_11, %c0_12] : memref<1x32xf32, #tpu.memory_space<vmem>>, vector<1x32xf32>
    %13 = tpu.transpose %11, [1, 0] : vector<8x32xf32> -> vector<32x8xf32>
    %cst_13 = arith.constant dense<0.000000e+00> : vector<1x8xf32>
    %14 = tpu.matmul %12, %13, %cst_13 {dimension_numbers = #tpu.dot_dimension_numbers<[1], [0], [0], [1], [0, 0, 1, 1], [], []>} : vector<1x32xf32>, vector<32x8xf32>, vector<1x8xf32> -> vector<1x8xf32>
    %c0_14 = arith.constant 0 : index
    %15 = memref.load %arg7[%c0_14] : memref<1xf32, #tpu.memory_space<smem>>
    %16 = vector.broadcast %15 : f32 to vector<1x8xf32>
    %17 = arith.addf %14, %16 : vector<1x8xf32>
    %c0_15 = arith.constant 0 : index
    %c0_16 = arith.constant 0 : index
    %18 = vector.load %arg8[%c0_15, %c0_16] : memref<1x8xf32, #tpu.memory_space<vmem>>, vector<1x8xf32>
    tpu.vector_store %arg8[%c0_15, %c0_16], %17 {strides = array<i32>} : memref<1x8xf32, #tpu.memory_space<vmem>>, vector<1x8xf32>,
    return
  }
  func.func @transform_0(%arg0: i32) -> (i32, i32) {
    %c0_i32 = arith.constant 0 : i32
    %c0_i32_0 = arith.constant 0 : i32
    return %arg0, %c0_i32 : i32, i32
  }
  func.func @transform_1(%arg0: i32) -> (i32, i32) {
    %c0_i32 = arith.constant 0 : i32
    %c0_i32_0 = arith.constant 0 : i32
    return %arg0, %c0_i32 : i32, i32
  }
  func.func @transform_2(%arg0: i32) -> (i32, i32) {
    %c0_i32 = arith.constant 0 : i32
    %c0_i32_0 = arith.constant 0 : i32
    %c0_i32_1 = arith.constant 0 : i32
    return %c0_i32, %c0_i32_0 : i32, i32
  }
  func.func @transform_3(%arg0: i32) -> (i32, i32) {
    %c0_i32 = arith.constant 0 : i32
    %c0_i32_0 = arith.constant 0 : i32
    %c0_i32_1 = arith.constant 0 : i32
    return %c0_i32, %c0_i32_0 : i32, i32
  }
  func.func @transform_4(%arg0: i32) -> (i32, i32) {
    %c0_i32 = arith.constant 0 : i32
    %c0_i32_0 = arith.constant 0 : i32
    %c0_i32_1 = arith.constant 0 : i32
    return %c0_i32, %c0_i32_0 : i32, i32
  }
  func.func @transform_5(%arg0: i32) -> (i32, i32) {
    %c0_i32 = arith.constant 0 : i32
    %c0_i32_0 = arith.constant 0 : i32
    %c0_i32_1 = arith.constant 0 : i32
    return %c0_i32, %c0_i32_0 : i32, i32
  }
  func.func @transform_6(%arg0: i32) -> i32 {
    %c0_i32 = arith.constant 0 : i32
    %c0_i32_0 = arith.constant 0 : i32
    return %c0_i32 : i32
  }
  func.func @transform_7(%arg0: i32) -> (i32, i32) {
    %c0_i32 = arith.constant 0 : i32
    %c0_i32_0 = arith.constant 0 : i32
    return %arg0, %c0_i32 : i32, i32
  }
}

module attributes {stable_mosaic.version = 11 : i64} {
  func.func @_kernel_col(%arg0: i32, %arg1: memref<8x32xf32, #tpu.memory_space<vmem>>, %arg2: memref<8x32xf32, #tpu.memory_space<vmem>>, %arg3: memref<32x32xf32, #tpu.memory_space<vmem>>, %arg4: memref<32x32xf32, #tpu.memory_space<vmem>>, %arg5: memref<1x32xf32, #tpu.memory_space<vmem>>, %arg6: memref<32x1xf32, #tpu.memory_space<vmem>>, %arg7: memref<1xf32, #tpu.memory_space<smem>>, %arg8: memref<1x8xf32, #tpu.memory_space<vmem>>) attributes {dimension_semantics = [#tpu.dimension_semantics<parallel>], iteration_bounds = array<i64: 1>, scalar_prefetch = 0 : i64, scratch_operands = 0 : i64, tpu.core_type = #tpu.core_type<tc>, window_params = [{transform_indices = @transform_0, window_bounds = array<i64: 8, 32>}, {transform_indices = @transform_1, window_bounds = array<i64: 8, 32>}, {pipeline_mode = #tpu.pipeline_mode<synchronous>, transform_indices = @transform_2, window_bounds = array<i64: 32, 32>}, {pipeline_mode = #tpu.pipeline_mode<synchronous>, transform_indices = @transform_3, window_bounds = array<i64: 32, 32>}, {pipeline_mode = #tpu.pipeline_mode<synchronous>, transform_indices = @transform_4, window_bounds = array<i64: 1, 32>}, {pipeline_mode = #tpu.pipeline_mode<synchronous>, transform_indices = @transform_5, window_bounds = array<i64: 32, 1>}, {transform_indices = @transform_6, window_bounds = array<i64: 1>}, {transform_indices = @transform_7, window_bounds = array<i64: 1, 8>}]} {
    %c0 = arith.constant 0 : index
    %c0_0 = arith.constant 0 : index
    %0 = vector.load %arg1[%c0, %c0_0] : memref<8x32xf32, #tpu.memory_space<vmem>>, vector<8x32xf32>
    %c0_1 = arith.constant 0 : index
    %c0_2 = arith.constant 0 : index
    %1 = vector.load %arg3[%c0_1, %c0_2] : memref<32x32xf32, #tpu.memory_space<vmem>>, vector<32x32xf32>
    %cst = arith.constant dense<0.000000e+00> : vector<8x32xf32>
    %2 = tpu.matmul %0, %1, %cst {dimension_numbers = #tpu.dot_dimension_numbers<[1], [0], [0], [1], [0, 0, 1, 1], [], []>} : vector<8x32xf32>, vector<32x32xf32>, vector<8x32xf32> -> vector<8x32xf32>
    %c0_3 = arith.constant 0 : index
    %c0_4 = arith.constant 0 : index
    %3 = vector.load %arg2[%c0_3, %c0_4] : memref<8x32xf32, #tpu.memory_space<vmem>>, vector<8x32xf32>
    %c0_5 = arith.constant 0 : index
    %c0_6 = arith.constant 0 : index
    %4 = vector.load %arg4[%c0_5, %c0_6] : memref<32x32xf32, #tpu.memory_space<vmem>>, vector<32x32xf32>
    %cst_7 = arith.constant dense<0.000000e+00> : vector<8x32xf32>
    %5 = tpu.matmul %3, %4, %cst_7 {dimension_numbers = #tpu.dot_dimension_numbers<[1], [0], [0], [1], [0, 0, 1, 1], [], []>} : vector<8x32xf32>, vector<32x32xf32>, vector<8x32xf32> -> vector<8x32xf32>
    %6 = arith.addf %2, %5 : vector<8x32xf32>
    %c0_8 = arith.constant 0 : index
    %c0_9 = arith.constant 0 : index
    %7 = vector.load %arg5[%c0_8, %c0_9] : memref<1x32xf32, #tpu.memory_space<vmem>>, vector<1x32xf32>
    %8 = vector.broadcast %7 : vector<1x32xf32> to vector<8x32xf32>
    %9 = arith.addf %6, %8 : vector<8x32xf32>
    %cst_10 = arith.constant 0.000000e+00 : f32
    %10 = vector.broadcast %cst_10 : f32 to vector<8x32xf32>
    %11 = arith.maximumf %9, %10 : vector<8x32xf32>
    %c0_11 = arith.constant 0 : index
    %c0_12 = arith.constant 0 : index
    %12 = vector.load %arg6[%c0_11, %c0_12] : memref<32x1xf32, #tpu.memory_space<vmem>>, vector<32x1xf32>
    %cst_13 = arith.constant dense<0.000000e+00> : vector<8x1xf32>
    %13 = tpu.matmul %11, %12, %cst_13 {dimension_numbers = #tpu.dot_dimension_numbers<[1], [0], [0], [1], [0, 0, 1, 1], [], []>} : vector<8x32xf32>, vector<32x1xf32>, vector<8x1xf32> -> vector<8x1xf32>
    %14 = tpu.transpose %13, [1, 0] : vector<8x1xf32> -> vector<1x8xf32>
    %c0_14 = arith.constant 0 : index
    %15 = memref.load %arg7[%c0_14] : memref<1xf32, #tpu.memory_space<smem>>
    %16 = vector.broadcast %15 : f32 to vector<1x8xf32>
    %17 = arith.addf %14, %16 : vector<1x8xf32>
    %c0_15 = arith.constant 0 : index
    %c0_16 = arith.constant 0 : index
    %18 = vector.load %arg8[%c0_15, %c0_16] : memref<1x8xf32, #tpu.memory_space<vmem>>, vector<1x8xf32>
    tpu.vector_store %arg8[%c0_15, %c0_16], %17 {strides = array<i32>} : memref<1x8xf32, #tpu.memory_space<vmem>>, vector<1x8xf32>,
    return
  }
  func.func @transform_0(%arg0: i32) -> (i32, i32) {
    %c0_i32 = arith.constant 0 : i32
    %c0_i32_0 = arith.constant 0 : i32
    return %arg0, %c0_i32 : i32, i32
  }
  func.func @transform_1(%arg0: i32) -> (i32, i32) {
    %c0_i32 = arith.constant 0 : i32
    %c0_i32_0 = arith.constant 0 : i32
    return %arg0, %c0_i32 : i32, i32
  }
  func.func @transform_2(%arg0: i32) -> (i32, i32) {
    %c0_i32 = arith.constant 0 : i32
    %c0_i32_0 = arith.constant 0 : i32
    %c0_i32_1 = arith.constant 0 : i32
    return %c0_i32, %c0_i32_0 : i32, i32
  }
  func.func @transform_3(%arg0: i32) -> (i32, i32) {
    %c0_i32 = arith.constant 0 : i32
    %c0_i32_0 = arith.constant 0 : i32
    %c0_i32_1 = arith.constant 0 : i32
    return %c0_i32, %c0_i32_0 : i32, i32
  }
  func.func @transform_4(%arg0: i32) -> (i32, i32) {
    %c0_i32 = arith.constant 0 : i32
    %c0_i32_0 = arith.constant 0 : i32
    %c0_i32_1 = arith.constant 0 : i32
    return %c0_i32, %c0_i32_0 : i32, i32
  }
  func.func @transform_5(%arg0: i32) -> (i32, i32) {
    %c0_i32 = arith.constant 0 : i32
    %c0_i32_0 = arith.constant 0 : i32
    %c0_i32_1 = arith.constant 0 : i32
    return %c0_i32, %c0_i32_0 : i32, i32
  }
  func.func @transform_6(%arg0: i32) -> i32 {
    %c0_i32 = arith.constant 0 : i32
    %c0_i32_0 = arith.constant 0 : i32
    return %c0_i32 : i32
  }
  func.func @transform_7(%arg0: i32) -> (i32, i32) {
    %c0_i32 = arith.constant 0 : i32
    %c0_i32_0 = arith.constant 0 : i32
    return %arg0, %c0_i32 : i32, i32
  }
}

module attributes {stable_mosaic.version = 11 : i64} {
  func.func @_kernel_row(%arg0: i32, %arg1: memref<8x32xf32, #tpu.memory_space<vmem>>, %arg2: memref<8x32xf32, #tpu.memory_space<vmem>>, %arg3: memref<32x32xf32, #tpu.memory_space<vmem>>, %arg4: memref<32x32xf32, #tpu.memory_space<vmem>>, %arg5: memref<1x32xf32, #tpu.memory_space<vmem>>, %arg6: memref<1x32xf32, #tpu.memory_space<vmem>>, %arg7: memref<1xf32, #tpu.memory_space<smem>>, %arg8: memref<1x8xf32, #tpu.memory_space<vmem>>) attributes {dimension_semantics = [#tpu.dimension_semantics<parallel>], iteration_bounds = array<i64: 1>, scalar_prefetch = 0 : i64, scratch_operands = 0 : i64, tpu.core_type = #tpu.core_type<tc>, window_params = [{transform_indices = @transform_0, window_bounds = array<i64: 8, 32>}, {transform_indices = @transform_1, window_bounds = array<i64: 8, 32>}, {pipeline_mode = #tpu.pipeline_mode<synchronous>, transform_indices = @transform_2, window_bounds = array<i64: 32, 32>}, {pipeline_mode = #tpu.pipeline_mode<synchronous>, transform_indices = @transform_3, window_bounds = array<i64: 32, 32>}, {pipeline_mode = #tpu.pipeline_mode<synchronous>, transform_indices = @transform_4, window_bounds = array<i64: 1, 32>}, {pipeline_mode = #tpu.pipeline_mode<synchronous>, transform_indices = @transform_5, window_bounds = array<i64: 1, 32>}, {transform_indices = @transform_6, window_bounds = array<i64: 1>}, {transform_indices = @transform_7, window_bounds = array<i64: 1, 8>}]} {
    %c0 = arith.constant 0 : index
    %c0_0 = arith.constant 0 : index
    %0 = vector.load %arg1[%c0, %c0_0] : memref<8x32xf32, #tpu.memory_space<vmem>>, vector<8x32xf32>
    %c0_1 = arith.constant 0 : index
    %c0_2 = arith.constant 0 : index
    %1 = vector.load %arg3[%c0_1, %c0_2] : memref<32x32xf32, #tpu.memory_space<vmem>>, vector<32x32xf32>
    %cst = arith.constant dense<0.000000e+00> : vector<8x32xf32>
    %2 = tpu.matmul %0, %1, %cst {dimension_numbers = #tpu.dot_dimension_numbers<[1], [0], [0], [1], [0, 0, 1, 1], [], []>} : vector<8x32xf32>, vector<32x32xf32>, vector<8x32xf32> -> vector<8x32xf32>
    %c0_3 = arith.constant 0 : index
    %c0_4 = arith.constant 0 : index
    %3 = vector.load %arg2[%c0_3, %c0_4] : memref<8x32xf32, #tpu.memory_space<vmem>>, vector<8x32xf32>
    %c0_5 = arith.constant 0 : index
    %c0_6 = arith.constant 0 : index
    %4 = vector.load %arg4[%c0_5, %c0_6] : memref<32x32xf32, #tpu.memory_space<vmem>>, vector<32x32xf32>
    %cst_7 = arith.constant dense<0.000000e+00> : vector<8x32xf32>
    %5 = tpu.matmul %3, %4, %cst_7 {dimension_numbers = #tpu.dot_dimension_numbers<[1], [0], [0], [1], [0, 0, 1, 1], [], []>} : vector<8x32xf32>, vector<32x32xf32>, vector<8x32xf32> -> vector<8x32xf32>
    %6 = arith.addf %2, %5 : vector<8x32xf32>
    %c0_8 = arith.constant 0 : index
    %c0_9 = arith.constant 0 : index
    %7 = vector.load %arg5[%c0_8, %c0_9] : memref<1x32xf32, #tpu.memory_space<vmem>>, vector<1x32xf32>
    %8 = vector.broadcast %7 : vector<1x32xf32> to vector<8x32xf32>
    %9 = arith.addf %6, %8 : vector<8x32xf32>
    %cst_10 = arith.constant 0.000000e+00 : f32
    %10 = vector.broadcast %cst_10 : f32 to vector<8x32xf32>
    %11 = arith.maximumf %9, %10 : vector<8x32xf32>
    %c0_11 = arith.constant 0 : index
    %c0_12 = arith.constant 0 : index
    %12 = vector.load %arg6[%c0_11, %c0_12] : memref<1x32xf32, #tpu.memory_space<vmem>>, vector<1x32xf32>
    %13 = tpu.transpose %11, [1, 0] : vector<8x32xf32> -> vector<32x8xf32>
    %cst_13 = arith.constant dense<0.000000e+00> : vector<1x8xf32>
    %14 = tpu.matmul %12, %13, %cst_13 {dimension_numbers = #tpu.dot_dimension_numbers<[1], [0], [0], [1], [0, 0, 1, 1], [], []>} : vector<1x32xf32>, vector<32x8xf32>, vector<1x8xf32> -> vector<1x8xf32>
    %c0_14 = arith.constant 0 : index
    %15 = memref.load %arg7[%c0_14] : memref<1xf32, #tpu.memory_space<smem>>
    %16 = vector.broadcast %15 : f32 to vector<1x8xf32>
    %17 = arith.addf %14, %16 : vector<1x8xf32>
    %c0_15 = arith.constant 0 : index
    %c0_16 = arith.constant 0 : index
    %18 = vector.load %arg8[%c0_15, %c0_16] : memref<1x8xf32, #tpu.memory_space<vmem>>, vector<1x8xf32>
    tpu.vector_store %arg8[%c0_15, %c0_16], %17 {strides = array<i32>} : memref<1x8xf32, #tpu.memory_space<vmem>>, vector<1x8xf32>,
    return
  }
  func.func @transform_0(%arg0: i32) -> (i32, i32) {
    %c0_i32 = arith.constant 0 : i32
    %c0_i32_0 = arith.constant 0 : i32
    return %arg0, %c0_i32 : i32, i32
  }
  func.func @transform_1(%arg0: i32) -> (i32, i32) {
    %c0_i32 = arith.constant 0 : i32
    %c0_i32_0 = arith.constant 0 : i32
    return %arg0, %c0_i32 : i32, i32
  }
  func.func @transform_2(%arg0: i32) -> (i32, i32) {
    %c0_i32 = arith.constant 0 : i32
    %c0_i32_0 = arith.constant 0 : i32
    %c0_i32_1 = arith.constant 0 : i32
    return %c0_i32, %c0_i32_0 : i32, i32
  }
  func.func @transform_3(%arg0: i32) -> (i32, i32) {
    %c0_i32 = arith.constant 0 : i32
    %c0_i32_0 = arith.constant 0 : i32
    %c0_i32_1 = arith.constant 0 : i32
    return %c0_i32, %c0_i32_0 : i32, i32
  }
  func.func @transform_4(%arg0: i32) -> (i32, i32) {
    %c0_i32 = arith.constant 0 : i32
    %c0_i32_0 = arith.constant 0 : i32
    %c0_i32_1 = arith.constant 0 : i32
    return %c0_i32, %c0_i32_0 : i32, i32
  }
  func.func @transform_5(%arg0: i32) -> (i32, i32) {
    %c0_i32 = arith.constant 0 : i32
    %c0_i32_0 = arith.constant 0 : i32
    %c0_i32_1 = arith.constant 0 : i32
    return %c0_i32, %c0_i32_0 : i32, i32
  }
  func.func @transform_6(%arg0: i32) -> i32 {
    %c0_i32 = arith.constant 0 : i32
    %c0_i32_0 = arith.constant 0 : i32
    return %c0_i32 : i32
  }
  func.func @transform_7(%arg0: i32) -> (i32, i32) {
    %c0_i32 = arith.constant 0 : i32
    %c0_i32_0 = arith.constant 0 : i32
    return %arg0, %c0_i32 : i32, i32
  }
}

</mosaic_0001>

<bundles_post_ra>
// kernel: tpu_custom_call.1
= control target key start
LH: loop header
LB: loop body
LE: loop exit
PB: predicated region body
PF: predicated region fallthrough
CT: control target
= control target key end

     0   :  { %13 = vsyncpa [#allocation4], 0  ;;  %s630_s0 = inlined_call_operand.vmem [shape: f32[8,32], index: 0, kind: input, shape index: {}]   ;;  %s631_s1 = inlined_call_operand.hbm [shape: f32[8,32], index: 1, kind: input, shape index: {}]   ;;  %s632_s2 = inlined_call_operand.vmem [shape: f32[32,32], index: 2, kind: input, shape index: {}]   ;;  %s633_s3 = inlined_call_operand.hbm [shape: f32[32,32], index: 3, kind: input, shape index: {}]   ;;  %s634_s4 = inlined_call_operand.vmem [shape: f32[1,32], index: 4, kind: input, shape index: {}]   ;;  %s635_s5 = inlined_call_operand.vmem [shape: f32[32,1], index: 5, kind: input, shape index: {}]   ;;  %s636_s6 = inlined_call_operand.<no memory space> [shape: f32[1], index: 6, kind: input, shape index: {}]   ;;  %s637_s7 = inlined_call_operand.hbm [shape: f32[1,8], index: 7, kind: output, shape index: {}]  }
   0x1   :  { %14 = vsyncpa [#allocation7], 0 }
   0x2   :  { %15 = vsyncpa [#allocation5], 0  ;;  %s500_s24 = smov [#allocation3]   ;;  %s501_s26 = smov [#allocation6]  }
   0x3   :  { %s24_s25 = sshll.u32 %s500_s24, 4  ;;  %s35_s27 = sshll.u32 %s501_s26, 4  ;;  %s25_s25 = int_to_ptr.vmem [resolvable:$true] %s24_s25  ;;  %s548_s27 = int_to_ptr.vmem [resolvable:$true] %s35_s27 }
   0x4   :  { %s428_s30 = scalar_lea.hbm %s631_s1, 128 }
   0x5   :  { %p429_p0 = scmp.ne.s32.totalorder %s631_s1, %s428_s30  ;;  %p432_p1 = scmp.lt.u32.totalorder %s428_s30, %s631_s1 }
   0x7   :  { %p434_p2 = pnand %p432_p1, %p429_p0 }
   0x9   :  { %437 = shalt.err (!%p434_p2)
}
   0xa   :  { %s438_s12 = scalar_lea.vmem %s25_s25, 128  ;;  %p443_p4 = scmp.lt.s32.totalorder %s25_s25, %s25_s25 }
   0xb   :  { %p439_p3 = scmp.ne.s32.totalorder %s25_s25, %s438_s12  ;;  %p444_p5 = scmp.lt.s32.totalorder %s438_s12, %s438_s12 }
   0xd   :  { %p445_p6 = por %p444_p5, %p443_p4 }
   0xf   :  { %p446_p7 = pnand %p445_p6, %p439_p3 }
  0x11   :  { %449 = shalt.err (!%p446_p7)
}
  0x12   :  { %27 = dma.hbm_to_vmem [thread:$0]  %s631_s1, 128, %s25_s25, [#allocation4]  }
  0x13   :  { %s450_s17 = scalar_lea.hbm %s633_s3, 512 }
  0x14   :  { %p451_p8 = scmp.ne.s32.totalorder %s633_s3, %s450_s17  ;;  %p454_p9 = scmp.lt.u32.totalorder %s450_s17, %s633_s3 }
  0x16   :  { %p456_p10 = pnand %p454_p9, %p451_p8 }
  0x18   :  { %459 = shalt.err (!%p456_p10)
}
  0x19   :  { %s460_s22 = scalar_lea.vmem %s548_s27, 512  ;;  %p465_p12 = scmp.lt.s32.totalorder %s548_s27, %s548_s27 }
  0x1a   :  { %p461_p11 = scmp.ne.s32.totalorder %s548_s27, %s460_s22  ;;  %p466_p13 = scmp.lt.s32.totalorder %s460_s22, %s460_s22 }
  0x1c   :  { %p467_p0 = por %p466_p13, %p465_p12 }
  0x1e   :  { %p468_p1 = pnand %p467_p0, %p461_p11 }
  0x20   :  { %471 = shalt.err (!%p468_p1)
}
  0x21   :  { %s502_s1 = smov 128   ;;  %s503_s23 = smov 8  }
  0x22   :  { %41 = dma.hbm_to_vmem [thread:$0]  %s633_s3, 512, %s548_s27, [#allocation7], %s502_s1, %s502_s1, %s503_s23  }
  0x23   :  { %494 = dma.done.wait [#allocation4], 128  }
  0x24   :  { %495 = vsyncadd [#allocation4], 4294967168 }
  0x25   :  { %496 = dma.done.wait [#allocation7], 512  }
  0x26   :  { %497 = vsyncadd [#allocation7], 4294966784  ;;  %v504_v0 = vmov 0.0|0.0   ;;  %vm505_vm0 = vmmov 0   ;;  %v506_v1 = vmov 0.0   ;;  %v60_v2 = vld [vmem:[#allocation6] sm:$0xff]  ;;  %v330_v32 = vstv %s636_s6 }
  0x27   :  { %402 = vmatprep.subr.bf16.mxu0 %v504_v0  ;;  %408 = vmatprep.subr.bf16.mxu1 %v504_v0  ;;  %v61_v3 = vld [vmem:[#allocation6 + $0x8] sm:$0xff]  ;;  %v55_v4 = vld [vmem:[%s632_s2] sm:$0xff]  ;;  %v56_v6 = vld [vmem:[%s632_s2 + $0x8] sm:$0xff]  ;;  %vm64_vm1 = vcmask 261120   ;;  %s507_s21 = smov [#allocation8]   ;;  %vm332_vm2 = vcmask 57344  }
  0x28   :  { %377 = vmatprep.mubr.msk.f32.mxu0 %vm505_vm0, %v506_v1  ;;  %388 = vmatprep.mubr.msk.f32.mxu1 %vm505_vm0, %v506_v1  ;;  %v403_v5 = vpack.c.bf16 %v61_v3, %v60_v2  ;;  %v62_v7 = vld [vmem:[#allocation6 + $0x10] sm:$0xff]  ;;  %v63_v8 = vld [vmem:[#allocation6 + $0x18] sm:$0xff]  ;;  %v409_v9 = vpack.c.bf16 %v56_v6, %v55_v4  ;;  %v57_v10 = vld [vmem:[%s632_s2 + $0x10] sm:$0xff]  ;;  %s340_s22 = sshll.u32 %s507_s21, 4  ;;  %s341_s22 = int_to_ptr.vmem [resolvable:$true] %s340_s22 }
  0x29   :  { %v58_v11 = vld [vmem:[%s632_s2 + $0x18] sm:$0xff]  ;;  %v406_v12 = vpack.c.bf16 %v63_v8, %v62_v7  ;;  %v59_v14 = vld [vmem:[#allocation3] sm:$0xff]  ;;  %v221_v17 = vld [vmem:[%s635_s5 + $0x8] sm:$0xff]  ;;  %s476_s1 = scalar_lea.vmem %s341_s22, 32  ;;  %p477_p3 = scmp.lt.s32.totalorder %s341_s22, %s341_s22 }
  0x2a   :  { %404 = vmatpush3.bf16.msra.mxu0 %v403_v5  ;;  %410 = vmatpush3.bf16.msra.mxu1 %v409_v9  ;;  %v412_v13 = vpack.c.bf16 %v58_v11, %v57_v10  ;;  %v54_v15 = vld [vmem:[%s630_s0] sm:$0xff]  ;;  %v222_v19 = vld [vmem:[%s635_s5 + $0x10] sm:$0xff]  ;;  %v223_v20 = vld [vmem:[%s635_s5 + $0x18] sm:$0xff] }
  0x2b   :  { %405 = vmatprep.subr.bf16.mxu0 %v504_v0  ;;  %411 = vmatprep.subr.bf16.mxu1 %v504_v0  ;;  %v220_v16 = vld [vmem:[%s635_s5] sm:$0xff]  ;;  %v418_v21 = vpack.c.bf16 %v223_v20, %v222_v19 }
  0x2c   :  { %v415_v18 = vpack.c.bf16 %v221_v17, %v220_v16  ;;  %v352_v24 = vld [vmem:[%s634_s4] ss:$0 sm:$0xff]  ;;  %s472_s4 = scalar_lea.vmem %s341_s22, 16 }
  0x2d   :  { %p473_p2 = scmp.ne.s32.totalorder %s341_s22, %s472_s4  ;;  %p478_p4 = scmp.lt.s32.totalorder %s476_s1, %s472_s4 }
  0x2e   :  { %407 = vmatpush3.bf16.msra.mxu0 %v406_v12  ;;  %413 = vmatpush3.bf16.msra.mxu1 %v412_v13 }
  0x2f   :  { %414 = vmatprep.subr.bf16.mxu0 %v504_v0  ;;  %p479_p5 = por %p478_p4, %p477_p3 }
  0x31   :  { %378 = vmatmul.mubr.msk.f32.vlgmr.msra.gmra.mrb[0].mxu0 %vm64_vm1, %v59_v14  ;;  %389 = vmatmul.mubr.msk.f32.vlgmr.msra.gmra.mrb[0].mxu1 %vm64_vm1, %v54_v15  ;;  %p480_p6 = pnand %p479_p5, %p473_p2 }
  0x32   :  { %399 = vmatprep.mubr.msk.f32.mxu0 %vm505_vm0, %v506_v1  ;;  %416 = vmatpush3.bf16.msra.mxu0 %v415_v18 }
  0x33   :  { %417 = vmatprep.subr.bf16.mxu0 %v504_v0 }
  0x36   :  { %419 = vmatpush3.bf16.msra.mxu0 %v418_v21 }
 0x104   :  { %v134_v22 = vpop.f32.mrb[0].mxu0  ;;  %v207_v23 = vpop.f32.mrb[0].mxu1 }
 0x105   :  { %v379_v25 = vpop.f32.mrb[1].mxu0  ;;  %v208_v26 = vadd.f32 %v207_v23, %v134_v22  ;;  %v390_v27 = vpop.f32.mrb[1].mxu1 }
 0x107   :  { %v218_v28 = vadd.f32 %v352_v24, %v208_v26 }
 0x109   :  { %v219_v29 = vmax.f32 %v218_v28, 0.0 }
 0x10b   :  { %400 = vmatmul.mubr.msk.f32.vlgmr.msra.gmra.mrb[2].mxu0 %vm64_vm1, %v219_v29 }
 0x1de   :  { %v293_v30 = vpop.f32.mrb[2].mxu0 }
 0x1df   :  { %297 = vxpose.xlu0.b32.start.end [1/1] (short) (narrow) %v293_v30, 8  ;;  %v401_v31 = vpop.f32.mrb[3].mxu0 }
 0x25f   :  { %v313_v33 = vpop.trf.xlu0 }
 0x260   :  { %v331_v34 = vadd.f32 %v330_v32, %v313_v33 }
 0x262   :  { %333 = vst.msk [vmem:[#allocation8] sm:$0x1] %vm332_vm2, %v331_v34 }
 0x263   :  { %483 = shalt.err (!%p480_p6)
}
 0x264   :  { %s484_s25 = scalar_lea.hbm %s637_s7, 16 }
 0x265   :  { %p485_p7 = scmp.ne.s32.totalorder %s637_s7, %s484_s25  ;;  %p488_p8 = scmp.lt.u32.totalorder %s484_s25, %s637_s7 }
 0x267   :  { %p490_p9 = pnand %p488_p8, %p485_p7 }
 0x269   :  { %493 = shalt.err (!%p490_p9)
}
 0x26a   :  { %343 = dma.vmem_to_hbm [thread:$0]  %s341_s22, 16, %s637_s7, [#allocation5]  }
 0x26b   :  { %498 = dma.done.wait [#allocation5], 16  }
 0x26c   :  { %499 = vsyncadd [#allocation5], 4294967280 }
 0x26d   :  { %347 = vsyncpa [#allocation4], 1 }
 0x26e   :  { %348 = vsyncpa [#allocation7], 1 }
 0x26f   :  { %349 = vsyncpa [#allocation5], 1 }

// kernel: tpu_custom_call.1
= control target key start
LH: loop header
LB: loop body
LE: loop exit
PB: predicated region body
PF: predicated region fallthrough
CT: control target
= control target key end

     0   :  { %13 = vsyncpa [#allocation4], 0  ;;  %s653_s0 = inlined_call_operand.hbm [shape: f32[8,32], index: 0, kind: input, shape index: {}]   ;;  %s654_s1 = inlined_call_operand.hbm [shape: f32[8,32], index: 1, kind: input, shape index: {}]   ;;  %s655_s2 = inlined_call_operand.hbm [shape: f32[32,32], index: 2, kind: input, shape index: {}]   ;;  %s656_s3 = inlined_call_operand.hbm [shape: f32[32,32], index: 3, kind: input, shape index: {}]   ;;  %s657_s4 = inlined_call_operand.vmem [shape: f32[1,32], index: 4, kind: input, shape index: {}]   ;;  %s658_s5 = inlined_call_operand.vmem [shape: f32[1,32], index: 5, kind: input, shape index: {}]   ;;  %s659_s6 = inlined_call_operand.<no memory space> [shape: f32[1], index: 6, kind: input, shape index: {}]   ;;  %s660_s7 = inlined_call_operand.hbm [shape: f32[1,8], index: 7, kind: output, shape index: {}]  }
   0x1   :  { %14 = vsyncpa [#allocation7], 0 }
   0x2   :  { %15 = vsyncpa [#allocation10], 0 }
   0x3   :  { %16 = vsyncpa [#allocation5], 0  ;;  %s527_s24 = smov [#allocation6]   ;;  %s528_s26 = smov [#allocation3]  }
   0x4   :  { %s33_s25 = sshll.u32 %s527_s24, 4  ;;  %s23_s27 = sshll.u32 %s528_s26, 4  ;;  %s34_s25 = int_to_ptr.vmem [resolvable:$true] %s33_s25  ;;  %s24_s27 = int_to_ptr.vmem [resolvable:$true] %s23_s27 }
   0x5   :  { %s409_s30 = scalar_lea.hbm %s654_s1, 128 }
   0x6   :  { %p410_p0 = scmp.ne.s32.totalorder %s654_s1, %s409_s30  ;;  %p413_p1 = scmp.lt.u32.totalorder %s409_s30, %s654_s1 }
   0x8   :  { %p415_p2 = pnand %p413_p1, %p410_p0 }
   0xa   :  { %418 = shalt.err (!%p415_p2)
}
   0xb   :  { %s419_s12 = scalar_lea.vmem %s34_s25, 128  ;;  %p424_p4 = scmp.lt.s32.totalorder %s34_s25, %s34_s25 }
   0xc   :  { %p420_p3 = scmp.ne.s32.totalorder %s34_s25, %s419_s12  ;;  %p425_p5 = scmp.lt.s32.totalorder %s419_s12, %s419_s12 }
   0xe   :  { %p426_p6 = por %p425_p5, %p424_p4 }
  0x10   :  { %p427_p7 = pnand %p426_p6, %p420_p3 }
  0x12   :  { %430 = shalt.err (!%p427_p7)
}
  0x13   :  { %36 = dma.hbm_to_vmem [thread:$0]  %s654_s1, 128, %s34_s25, [#allocation7]  }
  0x14   :  { %s431_s17 = scalar_lea.hbm %s653_s0, 128 }
  0x15   :  { %p432_p8 = scmp.ne.s32.totalorder %s653_s0, %s431_s17  ;;  %p435_p9 = scmp.lt.u32.totalorder %s431_s17, %s653_s0 }
  0x17   :  { %p437_p10 = pnand %p435_p9, %p432_p8 }
  0x19   :  { %440 = shalt.err (!%p437_p10)
}
  0x1a   :  { %s441_s22 = scalar_lea.vmem %s24_s27, 128  ;;  %p446_p12 = scmp.lt.s32.totalorder %s24_s27, %s24_s27 }
  0x1b   :  { %p442_p11 = scmp.ne.s32.totalorder %s24_s27, %s441_s22  ;;  %p447_p13 = scmp.lt.s32.totalorder %s441_s22, %s441_s22 }
  0x1d   :  { %p448_p0 = por %p447_p13, %p446_p12 }
  0x1f   :  { %p449_p1 = pnand %p448_p0, %p442_p11 }
  0x21   :  { %452 = shalt.err (!%p449_p1)
}
  0x22   :  { %26 = dma.hbm_to_vmem [thread:$0]  %s653_s0, 128, %s24_s27, [#allocation4]  }
  0x23   :  { %s529_s24 = smov [#allocation8]   ;;  %s453_s29 = scalar_lea.hbm %s655_s2, 512 }
  0x24   :  { %s42_s25 = sshll.u32 %s529_s24, 4  ;;  %p454_p2 = scmp.ne.s32.totalorder %s655_s2, %s453_s29  ;;  %s43_s25 = int_to_ptr.vmem [resolvable:$true] %s42_s25 }
  0x25   :  { %p457_p3 = scmp.lt.u32.totalorder %s453_s29, %s655_s2 }
  0x27   :  { %p459_p4 = pnand %p457_p3, %p454_p2 }
  0x29   :  { %462 = shalt.err (!%p459_p4)
}
  0x2a   :  { %s463_s11 = scalar_lea.vmem %s43_s25, 512  ;;  %p468_p6 = scmp.lt.s32.totalorder %s43_s25, %s43_s25 }
  0x2b   :  { %p464_p5 = scmp.ne.s32.totalorder %s43_s25, %s463_s11  ;;  %p469_p7 = scmp.lt.s32.totalorder %s463_s11, %s463_s11 }
  0x2d   :  { %p470_p8 = por %p469_p7, %p468_p6 }
  0x2f   :  { %p471_p9 = pnand %p470_p8, %p464_p5 }
  0x31   :  { %474 = shalt.err (!%p471_p9)
}
  0x32   :  { %s530_s0 = smov 128   ;;  %s531_s27 = smov 8  }
  0x33   :  { %48 = dma.hbm_to_vmem [thread:$0]  %s655_s2, 512, %s43_s25, [#allocation7], %s530_s0, %s530_s0, %s531_s27  }
  0x34   :  { %s532_s14 = smov [#allocation9]   ;;  %s475_s18 = scalar_lea.hbm %s656_s3, 512 }
  0x35   :  { %s54_s15 = sshll.u32 %s532_s14, 4  ;;  %p476_p10 = scmp.ne.s32.totalorder %s656_s3, %s475_s18  ;;  %s55_s15 = int_to_ptr.vmem [resolvable:$true] %s54_s15 }
  0x36   :  { %p479_p11 = scmp.lt.u32.totalorder %s475_s18, %s656_s3 }
  0x38   :  { %p481_p12 = pnand %p479_p11, %p476_p10 }
  0x3a   :  { %484 = shalt.err (!%p481_p12)
}
  0x3b   :  { %s485_s1 = scalar_lea.vmem %s55_s15, 512  ;;  %p490_p0 = scmp.lt.s32.totalorder %s55_s15, %s55_s15 }
  0x3c   :  { %p486_p13 = scmp.ne.s32.totalorder %s55_s15, %s485_s1  ;;  %p491_p1 = scmp.lt.s32.totalorder %s485_s1, %s485_s1 }
  0x3e   :  { %p492_p2 = por %p491_p1, %p490_p0 }
  0x40   :  { %p493_p3 = pnand %p492_p2, %p486_p13 }
  0x42   :  { %496 = shalt.err (!%p493_p3)
}
  0x43   :  { %60 = dma.hbm_to_vmem [thread:$0]  %s656_s3, 512, %s55_s15, [#allocation10], %s530_s0, %s530_s0, %s531_s27  }
  0x44   :  { %519 = dma.done.wait [#allocation4], 128  }
  0x45   :  { %520 = vsyncadd [#allocation4], 4294967168 }
  0x46   :  { %521 = dma.done.wait [#allocation7], 640  }
  0x47   :  { %522 = vsyncadd [#allocation7], 4294966656 }
  0x48   :  { %523 = dma.done.wait [#allocation10], 512  }
  0x49   :  { %524 = vsyncadd [#allocation10], 4294966784  ;;  %v533_v0 = vmov 0.0|0.0   ;;  %vm534_vm0 = vmmov 0   ;;  %v535_v1 = vmov 0.0   ;;  %v85_v2 = vld [vmem:[#allocation9] sm:$0xff]  ;;  %v247_v25 = vstv %s659_s6 }
  0x4a   :  { %387 = vmatprep.subr.bf16.mxu0 %v533_v0  ;;  %393 = vmatprep.subr.bf16.mxu1 %v533_v0  ;;  %v86_v3 = vld [vmem:[#allocation9 + $0x8] sm:$0xff]  ;;  %v80_v4 = vld [vmem:[#allocation8] sm:$0xff]  ;;  %v87_v7 = vld [vmem:[#allocation9 + $0x10] sm:$0xff]  ;;  %vm89_vm1 = vcmask 261120   ;;  %s536_s30 = smov [#allocation11]   ;;  %vm324_vm2 = vcmask 57344  }
  0x4b   :  { %368 = vmatprep.mubr.msk.f32.mxu0 %vm534_vm0, %v535_v1  ;;  %379 = vmatprep.mubr.msk.f32.mxu1 %vm534_vm0, %v535_v1  ;;  %v388_v5 = vpack.c.bf16 %v86_v3, %v85_v2  ;;  %v81_v6 = vld [vmem:[#allocation8 + $0x8] sm:$0xff]  ;;  %v88_v8 = vld [vmem:[#allocation9 + $0x18] sm:$0xff]  ;;  %v82_v10 = vld [vmem:[#allocation8 + $0x10] sm:$0xff]  ;;  %s332_s8 = sshll.u32 %s536_s30, 4  ;;  %s333_s8 = int_to_ptr.vmem [resolvable:$true] %s332_s8 }
  0x4c   :  { %v394_v9 = vpack.c.bf16 %v81_v6, %v80_v4  ;;  %v83_v11 = vld [vmem:[#allocation8 + $0x18] sm:$0xff]  ;;  %v391_v12 = vpack.c.bf16 %v88_v8, %v87_v7  ;;  %v79_v15 = vld [vmem:[#allocation3] sm:$0xff]  ;;  %s501_s9 = scalar_lea.vmem %s333_s8, 32  ;;  %p502_p5 = scmp.lt.s32.totalorder %s333_s8, %s333_s8 }
  0x4d   :  { %389 = vmatpush3.bf16.msra.mxu0 %v388_v5  ;;  %v397_v13 = vpack.c.bf16 %v83_v11, %v82_v10  ;;  %v84_v14 = vld [vmem:[#allocation6] sm:$0xff]  ;;  %v345_v18 = vld [vmem:[%s657_s4] ss:$0 sm:$0xff]  ;;  %s497_s4 = scalar_lea.vmem %s333_s8, 16 }
  0x4e   :  { %395 = vmatpush3.bf16.msra.mxu1 %v394_v9  ;;  %390 = vmatprep.subr.bf16.mxu0 %v533_v0  ;;  %v245_v24 = vld [vmem:[%s658_s5] sm:$0x1]  ;;  %p498_p4 = scmp.ne.s32.totalorder %s333_s8, %s497_s4  ;;  %p503_p6 = scmp.lt.s32.totalorder %s501_s9, %s497_s4 }
  0x4f   :  { %396 = vmatprep.subr.bf16.mxu1 %v533_v0 }
  0x50   :  { %p504_p7 = por %p503_p6, %p502_p5 }
  0x51   :  { %392 = vmatpush3.bf16.msra.mxu0 %v391_v12 }
  0x52   :  { %398 = vmatpush3.bf16.msra.mxu1 %v397_v13  ;;  %382 = vmatprep.subr.mxu0 %v535_v1  ;;  %p505_p8 = pnand %p504_p7, %p498_p4 }
  0x54   :  { %369 = vmatmul.mubr.msk.f32.vlgmr.msra.gmra.mrb[0].mxu0 %vm89_vm1, %v84_v14 }
  0x55   :  { %380 = vmatmul.mubr.msk.f32.vlgmr.msra.gmra.mrb[0].mxu1 %vm89_vm1, %v79_v15  ;;  %384 = vmatprep.mubr.msk.f32.mxu0 %vm534_vm0, %v535_v1 }
 0x127   :  { %v159_v16 = vpop.f32.mrb[0].mxu0 }
 0x128   :  { %v232_v17 = vpop.f32.mrb[0].mxu1  ;;  %v370_v19 = vpop.f32.mrb[1].mxu0 }
 0x129   :  { %v233_v20 = vadd.f32 %v232_v17, %v159_v16  ;;  %v381_v21 = vpop.f32.mrb[1].mxu1 }
 0x12b   :  { %v243_v22 = vadd.f32 %v345_v18, %v233_v20 }
 0x12d   :  { %v244_v23 = vmax.f32 %v243_v22, 0.0 }
 0x12f   :  { %383 = vmatpush3.xpose.msk.msra.mxu0 %vm89_vm1, %v244_v23 }
 0x132   :  { %385 = vmatmul.mubr.msk.f32.vlgmr.msra.gmra.mrb[2].mxu0 %vm89_vm1, %v245_v24 }
 0x205   :  { %v320_v26 = vpop.f32.mrb[2].mxu0 }
 0x206   :  { %v321_v27 = vadd.f32 %v320_v26, %v247_v25  ;;  %v386_v28 = vpop.f32.mrb[3].mxu0 }
 0x208   :  { %325 = vst.msk [vmem:[#allocation11] sm:$0x1] %vm324_vm2, %v321_v27 }
 0x209   :  { %508 = shalt.err (!%p505_p8)
}
 0x20a   :  { %s509_s6 = scalar_lea.hbm %s660_s7, 16 }
 0x20b   :  { %p510_p9 = scmp.ne.s32.totalorder %s660_s7, %s509_s6  ;;  %p513_p10 = scmp.lt.u32.totalorder %s509_s6, %s660_s7 }
 0x20d   :  { %p515_p11 = pnand %p513_p10, %p510_p9 }
 0x20f   :  { %518 = shalt.err (!%p515_p11)
}
 0x210   :  { %335 = dma.vmem_to_hbm [thread:$0]  %s333_s8, 16, %s660_s7, [#allocation5]  }
 0x211   :  { %525 = dma.done.wait [#allocation5], 16  }
 0x212   :  { %526 = vsyncadd [#allocation5], 4294967280 }
 0x213   :  { %339 = vsyncpa [#allocation4], 1 }
 0x214   :  { %340 = vsyncpa [#allocation7], 1 }
 0x215   :  { %341 = vsyncpa [#allocation10], 1 }
 0x216   :  { %342 = vsyncpa [#allocation5], 1 }

// kernel: tpu_custom_call.1
= control target key start
LH: loop header
LB: loop body
LE: loop exit
PB: predicated region body
PF: predicated region fallthrough
CT: control target
= control target key end

     0   :  { %13 = vsyncpa [#allocation4], 0  ;;  %s630_s0 = inlined_call_operand.vmem [shape: f32[8,32], index: 0, kind: input, shape index: {}]   ;;  %s631_s1 = inlined_call_operand.hbm [shape: f32[8,32], index: 1, kind: input, shape index: {}]   ;;  %s632_s2 = inlined_call_operand.vmem [shape: f32[32,32], index: 2, kind: input, shape index: {}]   ;;  %s633_s3 = inlined_call_operand.hbm [shape: f32[32,32], index: 3, kind: input, shape index: {}]   ;;  %s634_s4 = inlined_call_operand.vmem [shape: f32[1,32], index: 4, kind: input, shape index: {}]   ;;  %s635_s5 = inlined_call_operand.vmem [shape: f32[32,1], index: 5, kind: input, shape index: {}]   ;;  %s636_s6 = inlined_call_operand.<no memory space> [shape: f32[1], index: 6, kind: input, shape index: {}]   ;;  %s637_s7 = inlined_call_operand.hbm [shape: f32[1,8], index: 7, kind: output, shape index: {}]  }
   0x1   :  { %14 = vsyncpa [#allocation7], 0 }
   0x2   :  { %15 = vsyncpa [#allocation5], 0  ;;  %s500_s24 = smov [#allocation3]   ;;  %s501_s26 = smov [#allocation6]  }
   0x3   :  { %s24_s25 = sshll.u32 %s500_s24, 4  ;;  %s35_s27 = sshll.u32 %s501_s26, 4  ;;  %s25_s25 = int_to_ptr.vmem [resolvable:$true] %s24_s25  ;;  %s548_s27 = int_to_ptr.vmem [resolvable:$true] %s35_s27 }
   0x4   :  { %s428_s30 = scalar_lea.hbm %s631_s1, 128 }
   0x5   :  { %p429_p0 = scmp.ne.s32.totalorder %s631_s1, %s428_s30  ;;  %p432_p1 = scmp.lt.u32.totalorder %s428_s30, %s631_s1 }
   0x7   :  { %p434_p2 = pnand %p432_p1, %p429_p0 }
   0x9   :  { %437 = shalt.err (!%p434_p2)
}
   0xa   :  { %s438_s12 = scalar_lea.vmem %s25_s25, 128  ;;  %p443_p4 = scmp.lt.s32.totalorder %s25_s25, %s25_s25 }
   0xb   :  { %p439_p3 = scmp.ne.s32.totalorder %s25_s25, %s438_s12  ;;  %p444_p5 = scmp.lt.s32.totalorder %s438_s12, %s438_s12 }
   0xd   :  { %p445_p6 = por %p444_p5, %p443_p4 }
   0xf   :  { %p446_p7 = pnand %p445_p6, %p439_p3 }
  0x11   :  { %449 = shalt.err (!%p446_p7)
}
  0x12   :  { %27 = dma.hbm_to_vmem [thread:$0]  %s631_s1, 128, %s25_s25, [#allocation4]  }
  0x13   :  { %s450_s17 = scalar_lea.hbm %s633_s3, 512 }
  0x14   :  { %p451_p8 = scmp.ne.s32.totalorder %s633_s3, %s450_s17  ;;  %p454_p9 = scmp.lt.u32.totalorder %s450_s17, %s633_s3 }
  0x16   :  { %p456_p10 = pnand %p454_p9, %p451_p8 }
  0x18   :  { %459 = shalt.err (!%p456_p10)
}
  0x19   :  { %s460_s22 = scalar_lea.vmem %s548_s27, 512  ;;  %p465_p12 = scmp.lt.s32.totalorder %s548_s27, %s548_s27 }
  0x1a   :  { %p461_p11 = scmp.ne.s32.totalorder %s548_s27, %s460_s22  ;;  %p466_p13 = scmp.lt.s32.totalorder %s460_s22, %s460_s22 }
  0x1c   :  { %p467_p0 = por %p466_p13, %p465_p12 }
  0x1e   :  { %p468_p1 = pnand %p467_p0, %p461_p11 }
  0x20   :  { %471 = shalt.err (!%p468_p1)
}
  0x21   :  { %s502_s1 = smov 128   ;;  %s503_s23 = smov 8  }
  0x22   :  { %41 = dma.hbm_to_vmem [thread:$0]  %s633_s3, 512, %s548_s27, [#allocation7], %s502_s1, %s502_s1, %s503_s23  }
  0x23   :  { %494 = dma.done.wait [#allocation4], 128  }
  0x24   :  { %495 = vsyncadd [#allocation4], 4294967168 }
  0x25   :  { %496 = dma.done.wait [#allocation7], 512  }
  0x26   :  { %497 = vsyncadd [#allocation7], 4294966784  ;;  %v504_v0 = vmov 0.0|0.0   ;;  %vm505_vm0 = vmmov 0   ;;  %v506_v1 = vmov 0.0   ;;  %v60_v2 = vld [vmem:[#allocation6] sm:$0xff]  ;;  %v330_v32 = vstv %s636_s6 }
  0x27   :  { %402 = vmatprep.subr.bf16.mxu0 %v504_v0  ;;  %408 = vmatprep.subr.bf16.mxu1 %v504_v0  ;;  %v61_v3 = vld [vmem:[#allocation6 + $0x8] sm:$0xff]  ;;  %v55_v4 = vld [vmem:[%s632_s2] sm:$0xff]  ;;  %v56_v6 = vld [vmem:[%s632_s2 + $0x8] sm:$0xff]  ;;  %vm64_vm1 = vcmask 261120   ;;  %s507_s21 = smov [#allocation8]   ;;  %vm332_vm2 = vcmask 57344  }
  0x28   :  { %377 = vmatprep.mubr.msk.f32.mxu0 %vm505_vm0, %v506_v1  ;;  %388 = vmatprep.mubr.msk.f32.mxu1 %vm505_vm0, %v506_v1  ;;  %v403_v5 = vpack.c.bf16 %v61_v3, %v60_v2  ;;  %v62_v7 = vld [vmem:[#allocation6 + $0x10] sm:$0xff]  ;;  %v63_v8 = vld [vmem:[#allocation6 + $0x18] sm:$0xff]  ;;  %v409_v9 = vpack.c.bf16 %v56_v6, %v55_v4  ;;  %v57_v10 = vld [vmem:[%s632_s2 + $0x10] sm:$0xff]  ;;  %s340_s22 = sshll.u32 %s507_s21, 4  ;;  %s341_s22 = int_to_ptr.vmem [resolvable:$true] %s340_s22 }
  0x29   :  { %v58_v11 = vld [vmem:[%s632_s2 + $0x18] sm:$0xff]  ;;  %v406_v12 = vpack.c.bf16 %v63_v8, %v62_v7  ;;  %v59_v14 = vld [vmem:[#allocation3] sm:$0xff]  ;;  %v221_v17 = vld [vmem:[%s635_s5 + $0x8] sm:$0xff]  ;;  %s476_s1 = scalar_lea.vmem %s341_s22, 32  ;;  %p477_p3 = scmp.lt.s32.totalorder %s341_s22, %s341_s22 }
  0x2a   :  { %404 = vmatpush3.bf16.msra.mxu0 %v403_v5  ;;  %410 = vmatpush3.bf16.msra.mxu1 %v409_v9  ;;  %v412_v13 = vpack.c.bf16 %v58_v11, %v57_v10  ;;  %v54_v15 = vld [vmem:[%s630_s0] sm:$0xff]  ;;  %v222_v19 = vld [vmem:[%s635_s5 + $0x10] sm:$0xff]  ;;  %v223_v20 = vld [vmem:[%s635_s5 + $0x18] sm:$0xff] }
  0x2b   :  { %405 = vmatprep.subr.bf16.mxu0 %v504_v0  ;;  %411 = vmatprep.subr.bf16.mxu1 %v504_v0  ;;  %v220_v16 = vld [vmem:[%s635_s5] sm:$0xff]  ;;  %v418_v21 = vpack.c.bf16 %v223_v20, %v222_v19 }
  0x2c   :  { %v415_v18 = vpack.c.bf16 %v221_v17, %v220_v16  ;;  %v352_v24 = vld [vmem:[%s634_s4] ss:$0 sm:$0xff]  ;;  %s472_s4 = scalar_lea.vmem %s341_s22, 16 }
  0x2d   :  { %p473_p2 = scmp.ne.s32.totalorder %s341_s22, %s472_s4  ;;  %p478_p4 = scmp.lt.s32.totalorder %s476_s1, %s472_s4 }
  0x2e   :  { %407 = vmatpush3.bf16.msra.mxu0 %v406_v12  ;;  %413 = vmatpush3.bf16.msra.mxu1 %v412_v13 }
  0x2f   :  { %414 = vmatprep.subr.bf16.mxu0 %v504_v0  ;;  %p479_p5 = por %p478_p4, %p477_p3 }
  0x31   :  { %378 = vmatmul.mubr.msk.f32.vlgmr.msra.gmra.mrb[0].mxu0 %vm64_vm1, %v59_v14  ;;  %389 = vmatmul.mubr.msk.f32.vlgmr.msra.gmra.mrb[0].mxu1 %vm64_vm1, %v54_v15  ;;  %p480_p6 = pnand %p479_p5, %p473_p2 }
  0x32   :  { %399 = vmatprep.mubr.msk.f32.mxu0 %vm505_vm0, %v506_v1  ;;  %416 = vmatpush3.bf16.msra.mxu0 %v415_v18 }
  0x33   :  { %417 = vmatprep.subr.bf16.mxu0 %v504_v0 }
  0x36   :  { %419 = vmatpush3.bf16.msra.mxu0 %v418_v21 }
 0x104   :  { %v134_v22 = vpop.f32.mrb[0].mxu0  ;;  %v207_v23 = vpop.f32.mrb[0].mxu1 }
 0x105   :  { %v379_v25 = vpop.f32.mrb[1].mxu0  ;;  %v208_v26 = vadd.f32 %v207_v23, %v134_v22  ;;  %v390_v27 = vpop.f32.mrb[1].mxu1 }
 0x107   :  { %v218_v28 = vadd.f32 %v352_v24, %v208_v26 }
 0x109   :  { %v219_v29 = vmax.f32 %v218_v28, 0.0 }
 0x10b   :  { %400 = vmatmul.mubr.msk.f32.vlgmr.msra.gmra.mrb[2].mxu0 %vm64_vm1, %v219_v29 }
 0x1de   :  { %v293_v30 = vpop.f32.mrb[2].mxu0 }
 0x1df   :  { %297 = vxpose.xlu0.b32.start.end [1/1] (short) (narrow) %v293_v30, 8  ;;  %v401_v31 = vpop.f32.mrb[3].mxu0 }
 0x25f   :  { %v313_v33 = vpop.trf.xlu0 }
 0x260   :  { %v331_v34 = vadd.f32 %v330_v32, %v313_v33 }
 0x262   :  { %333 = vst.msk [vmem:[#allocation8] sm:$0x1] %vm332_vm2, %v331_v34 }
 0x263   :  { %483 = shalt.err (!%p480_p6)
}
 0x264   :  { %s484_s25 = scalar_lea.hbm %s637_s7, 16 }
 0x265   :  { %p485_p7 = scmp.ne.s32.totalorder %s637_s7, %s484_s25  ;;  %p488_p8 = scmp.lt.u32.totalorder %s484_s25, %s637_s7 }
 0x267   :  { %p490_p9 = pnand %p488_p8, %p485_p7 }
 0x269   :  { %493 = shalt.err (!%p490_p9)
}
 0x26a   :  { %343 = dma.vmem_to_hbm [thread:$0]  %s341_s22, 16, %s637_s7, [#allocation5]  }
 0x26b   :  { %498 = dma.done.wait [#allocation5], 16  }
 0x26c   :  { %499 = vsyncadd [#allocation5], 4294967280 }
 0x26d   :  { %347 = vsyncpa [#allocation4], 1 }
 0x26e   :  { %348 = vsyncpa [#allocation7], 1 }
 0x26f   :  { %349 = vsyncpa [#allocation5], 1 }

// kernel: tpu_custom_call.1
= control target key start
LH: loop header
LB: loop body
LE: loop exit
PB: predicated region body
PF: predicated region fallthrough
CT: control target
= control target key end

     0   :  { %13 = vsyncpa [#allocation4], 0  ;;  %s653_s0 = inlined_call_operand.hbm [shape: f32[8,32], index: 0, kind: input, shape index: {}]   ;;  %s654_s1 = inlined_call_operand.hbm [shape: f32[8,32], index: 1, kind: input, shape index: {}]   ;;  %s655_s2 = inlined_call_operand.hbm [shape: f32[32,32], index: 2, kind: input, shape index: {}]   ;;  %s656_s3 = inlined_call_operand.hbm [shape: f32[32,32], index: 3, kind: input, shape index: {}]   ;;  %s657_s4 = inlined_call_operand.vmem [shape: f32[1,32], index: 4, kind: input, shape index: {}]   ;;  %s658_s5 = inlined_call_operand.vmem [shape: f32[1,32], index: 5, kind: input, shape index: {}]   ;;  %s659_s6 = inlined_call_operand.<no memory space> [shape: f32[1], index: 6, kind: input, shape index: {}]   ;;  %s660_s7 = inlined_call_operand.hbm [shape: f32[1,8], index: 7, kind: output, shape index: {}]  }
   0x1   :  { %14 = vsyncpa [#allocation7], 0 }
   0x2   :  { %15 = vsyncpa [#allocation10], 0 }
   0x3   :  { %16 = vsyncpa [#allocation5], 0  ;;  %s527_s24 = smov [#allocation6]   ;;  %s528_s26 = smov [#allocation3]  }
   0x4   :  { %s33_s25 = sshll.u32 %s527_s24, 4  ;;  %s23_s27 = sshll.u32 %s528_s26, 4  ;;  %s34_s25 = int_to_ptr.vmem [resolvable:$true] %s33_s25  ;;  %s24_s27 = int_to_ptr.vmem [resolvable:$true] %s23_s27 }
   0x5   :  { %s409_s30 = scalar_lea.hbm %s654_s1, 128 }
   0x6   :  { %p410_p0 = scmp.ne.s32.totalorder %s654_s1, %s409_s30  ;;  %p413_p1 = scmp.lt.u32.totalorder %s409_s30, %s654_s1 }
   0x8   :  { %p415_p2 = pnand %p413_p1, %p410_p0 }
   0xa   :  { %418 = shalt.err (!%p415_p2)
}
   0xb   :  { %s419_s12 = scalar_lea.vmem %s34_s25, 128  ;;  %p424_p4 = scmp.lt.s32.totalorder %s34_s25, %s34_s25 }
   0xc   :  { %p420_p3 = scmp.ne.s32.totalorder %s34_s25, %s419_s12  ;;  %p425_p5 = scmp.lt.s32.totalorder %s419_s12, %s419_s12 }
   0xe   :  { %p426_p6 = por %p425_p5, %p424_p4 }
  0x10   :  { %p427_p7 = pnand %p426_p6, %p420_p3 }
  0x12   :  { %430 = shalt.err (!%p427_p7)
}
  0x13   :  { %36 = dma.hbm_to_vmem [thread:$0]  %s654_s1, 128, %s34_s25, [#allocation7]  }
  0x14   :  { %s431_s17 = scalar_lea.hbm %s653_s0, 128 }
  0x15   :  { %p432_p8 = scmp.ne.s32.totalorder %s653_s0, %s431_s17  ;;  %p435_p9 = scmp.lt.u32.totalorder %s431_s17, %s653_s0 }
  0x17   :  { %p437_p10 = pnand %p435_p9, %p432_p8 }
  0x19   :  { %440 = shalt.err (!%p437_p10)
}
  0x1a   :  { %s441_s22 = scalar_lea.vmem %s24_s27, 128  ;;  %p446_p12 = scmp.lt.s32.totalorder %s24_s27, %s24_s27 }
  0x1b   :  { %p442_p11 = scmp.ne.s32.totalorder %s24_s27, %s441_s22  ;;  %p447_p13 = scmp.lt.s32.totalorder %s441_s22, %s441_s22 }
  0x1d   :  { %p448_p0 = por %p447_p13, %p446_p12 }
  0x1f   :  { %p449_p1 = pnand %p448_p0, %p442_p11 }
  0x21   :  { %452 = shalt.err (!%p449_p1)
}
  0x22   :  { %26 = dma.hbm_to_vmem [thread:$0]  %s653_s0, 128, %s24_s27, [#allocation4]  }
  0x23   :  { %s529_s24 = smov [#allocation8]   ;;  %s453_s29 = scalar_lea.hbm %s655_s2, 512 }
  0x24   :  { %s42_s25 = sshll.u32 %s529_s24, 4  ;;  %p454_p2 = scmp.ne.s32.totalorder %s655_s2, %s453_s29  ;;  %s43_s25 = int_to_ptr.vmem [resolvable:$true] %s42_s25 }
  0x25   :  { %p457_p3 = scmp.lt.u32.totalorder %s453_s29, %s655_s2 }
  0x27   :  { %p459_p4 = pnand %p457_p3, %p454_p2 }
  0x29   :  { %462 = shalt.err (!%p459_p4)
}
  0x2a   :  { %s463_s11 = scalar_lea.vmem %s43_s25, 512  ;;  %p468_p6 = scmp.lt.s32.totalorder %s43_s25, %s43_s25 }
  0x2b   :  { %p464_p5 = scmp.ne.s32.totalorder %s43_s25, %s463_s11  ;;  %p469_p7 = scmp.lt.s32.totalorder %s463_s11, %s463_s11 }
  0x2d   :  { %p470_p8 = por %p469_p7, %p468_p6 }
  0x2f   :  { %p471_p9 = pnand %p470_p8, %p464_p5 }
  0x31   :  { %474 = shalt.err (!%p471_p9)
}
  0x32   :  { %s530_s0 = smov 128   ;;  %s531_s27 = smov 8  }
  0x33   :  { %48 = dma.hbm_to_vmem [thread:$0]  %s655_s2, 512, %s43_s25, [#allocation7], %s530_s0, %s530_s0, %s531_s27  }
  0x34   :  { %s532_s14 = smov [#allocation9]   ;;  %s475_s18 = scalar_lea.hbm %s656_s3, 512 }
  0x35   :  { %s54_s15 = sshll.u32 %s532_s14, 4  ;;  %p476_p10 = scmp.ne.s32.totalorder %s656_s3, %s475_s18  ;;  %s55_s15 = int_to_ptr.vmem [resolvable:$true] %s54_s15 }
  0x36   :  { %p479_p11 = scmp.lt.u32.totalorder %s475_s18, %s656_s3 }
  0x38   :  { %p481_p12 = pnand %p479_p11, %p476_p10 }
  0x3a   :  { %484 = shalt.err (!%p481_p12)
}
  0x3b   :  { %s485_s1 = scalar_lea.vmem %s55_s15, 512  ;;  %p490_p0 = scmp.lt.s32.totalorder %s55_s15, %s55_s15 }
  0x3c   :  { %p486_p13 = scmp.ne.s32.totalorder %s55_s15, %s485_s1  ;;  %p491_p1 = scmp.lt.s32.totalorder %s485_s1, %s485_s1 }
  0x3e   :  { %p492_p2 = por %p491_p1, %p490_p0 }
  0x40   :  { %p493_p3 = pnand %p492_p2, %p486_p13 }
  0x42   :  { %496 = shalt.err (!%p493_p3)
}
  0x43   :  { %60 = dma.hbm_to_vmem [thread:$0]  %s656_s3, 512, %s55_s15, [#allocation10], %s530_s0, %s530_s0, %s531_s27  }
  0x44   :  { %519 = dma.done.wait [#allocation4], 128  }
  0x45   :  { %520 = vsyncadd [#allocation4], 4294967168 }
  0x46   :  { %521 = dma.done.wait [#allocation7], 640  }
  0x47   :  { %522 = vsyncadd [#allocation7], 4294966656 }
  0x48   :  { %523 = dma.done.wait [#allocation10], 512  }
  0x49   :  { %524 = vsyncadd [#allocation10], 4294966784  ;;  %v533_v0 = vmov 0.0|0.0   ;;  %vm534_vm0 = vmmov 0   ;;  %v535_v1 = vmov 0.0   ;;  %v85_v2 = vld [vmem:[#allocation9] sm:$0xff]  ;;  %v247_v25 = vstv %s659_s6 }
  0x4a   :  { %387 = vmatprep.subr.bf16.mxu0 %v533_v0  ;;  %393 = vmatprep.subr.bf16.mxu1 %v533_v0  ;;  %v86_v3 = vld [vmem:[#allocation9 + $0x8] sm:$0xff]  ;;  %v80_v4 = vld [vmem:[#allocation8] sm:$0xff]  ;;  %v87_v7 = vld [vmem:[#allocation9 + $0x10] sm:$0xff]  ;;  %vm89_vm1 = vcmask 261120   ;;  %s536_s30 = smov [#allocation11]   ;;  %vm324_vm2 = vcmask 57344  }
  0x4b   :  { %368 = vmatprep.mubr.msk.f32.mxu0 %vm534_vm0, %v535_v1  ;;  %379 = vmatprep.mubr.msk.f32.mxu1 %vm534_vm0, %v535_v1  ;;  %v388_v5 = vpack.c.bf16 %v86_v3, %v85_v2  ;;  %v81_v6 = vld [vmem:[#allocation8 + $0x8] sm:$0xff]  ;;  %v88_v8 = vld [vmem:[#allocation9 + $0x18] sm:$0xff]  ;;  %v82_v10 = vld [vmem:[#allocation8 + $0x10] sm:$0xff]  ;;  %s332_s8 = sshll.u32 %s536_s30, 4  ;;  %s333_s8 = int_to_ptr.vmem [resolvable:$true] %s332_s8 }
  0x4c   :  { %v394_v9 = vpack.c.bf16 %v81_v6, %v80_v4  ;;  %v83_v11 = vld [vmem:[#allocation8 + $0x18] sm:$0xff]  ;;  %v391_v12 = vpack.c.bf16 %v88_v8, %v87_v7  ;;  %v79_v15 = vld [vmem:[#allocation3] sm:$0xff]  ;;  %s501_s9 = scalar_lea.vmem %s333_s8, 32  ;;  %p502_p5 = scmp.lt.s32.totalorder %s333_s8, %s333_s8 }
  0x4d   :  { %389 = vmatpush3.bf16.msra.mxu0 %v388_v5  ;;  %v397_v13 = vpack.c.bf16 %v83_v11, %v82_v10  ;;  %v84_v14 = vld [vmem:[#allocation6] sm:$0xff]  ;;  %v345_v18 = vld [vmem:[%s657_s4] ss:$0 sm:$0xff]  ;;  %s497_s4 = scalar_lea.vmem %s333_s8, 16 }
  0x4e   :  { %395 = vmatpush3.bf16.msra.mxu1 %v394_v9  ;;  %390 = vmatprep.subr.bf16.mxu0 %v533_v0  ;;  %v245_v24 = vld [vmem:[%s658_s5] sm:$0x1]  ;;  %p498_p4 = scmp.ne.s32.totalorder %s333_s8, %s497_s4  ;;  %p503_p6 = scmp.lt.s32.totalorder %s501_s9, %s497_s4 }
  0x4f   :  { %396 = vmatprep.subr.bf16.mxu1 %v533_v0 }
  0x50   :  { %p504_p7 = por %p503_p6, %p502_p5 }
  0x51   :  { %392 = vmatpush3.bf16.msra.mxu0 %v391_v12 }
  0x52   :  { %398 = vmatpush3.bf16.msra.mxu1 %v397_v13  ;;  %382 = vmatprep.subr.mxu0 %v535_v1  ;;  %p505_p8 = pnand %p504_p7, %p498_p4 }
  0x54   :  { %369 = vmatmul.mubr.msk.f32.vlgmr.msra.gmra.mrb[0].mxu0 %vm89_vm1, %v84_v14 }
  0x55   :  { %380 = vmatmul.mubr.msk.f32.vlgmr.msra.gmra.mrb[0].mxu1 %vm89_vm1, %v79_v15  ;;  %384 = vmatprep.mubr.msk.f32.mxu0 %vm534_vm0, %v535_v1 }
 0x127   :  { %v159_v16 = vpop.f32.mrb[0].mxu0 }
 0x128   :  { %v232_v17 = vpop.f32.mrb[0].mxu1  ;;  %v370_v19 = vpop.f32.mrb[1].mxu0 }
 0x129   :  { %v233_v20 = vadd.f32 %v232_v17, %v159_v16  ;;  %v381_v21 = vpop.f32.mrb[1].mxu1 }
 0x12b   :  { %v243_v22 = vadd.f32 %v345_v18, %v233_v20 }
 0x12d   :  { %v244_v23 = vmax.f32 %v243_v22, 0.0 }
 0x12f   :  { %383 = vmatpush3.xpose.msk.msra.mxu0 %vm89_vm1, %v244_v23 }
 0x132   :  { %385 = vmatmul.mubr.msk.f32.vlgmr.msra.gmra.mrb[2].mxu0 %vm89_vm1, %v245_v24 }
 0x205   :  { %v320_v26 = vpop.f32.mrb[2].mxu0 }
 0x206   :  { %v321_v27 = vadd.f32 %v320_v26, %v247_v25  ;;  %v386_v28 = vpop.f32.mrb[3].mxu0 }
 0x208   :  { %325 = vst.msk [vmem:[#allocation11] sm:$0x1] %vm324_vm2, %v321_v27 }
 0x209   :  { %508 = shalt.err (!%p505_p8)
}
 0x20a   :  { %s509_s6 = scalar_lea.hbm %s660_s7, 16 }
 0x20b   :  { %p510_p9 = scmp.ne.s32.totalorder %s660_s7, %s509_s6  ;;  %p513_p10 = scmp.lt.u32.totalorder %s509_s6, %s660_s7 }
 0x20d   :  { %p515_p11 = pnand %p513_p10, %p510_p9 }
 0x20f   :  { %518 = shalt.err (!%p515_p11)
}
 0x210   :  { %335 = dma.vmem_to_hbm [thread:$0]  %s333_s8, 16, %s660_s7, [#allocation5]  }
 0x211   :  { %525 = dma.done.wait [#allocation5], 16  }
 0x212   :  { %526 = vsyncadd [#allocation5], 4294967280 }
 0x213   :  { %339 = vsyncpa [#allocation4], 1 }
 0x214   :  { %340 = vsyncpa [#allocation7], 1 }
 0x215   :  { %341 = vsyncpa [#allocation10], 1 }
 0x216   :  { %342 = vsyncpa [#allocation5], 1 }

</bundles_post_ra>
